<compile_context>
chip_gen: v7x
topology: tpu7x:2x2x1
jax: 0.10.0
libtpu: 0.0.40
codegen_flags: <defaults>
</compile_context>

<pallas_src>
import jax
import jax.numpy as jnp
from jax.experimental import pallas as pl
from jax.experimental.pallas import tpu as pltpu

IN_FEATURES = 3 * 28 * 28   # 2352
HIDDEN = 100
NUM_CLASS = 10

H_PAD = 128                 # hidden padded to a full lane width
C_PAD = 128                 # classifier output padded to a full lane width
MAX_TILE_B = 1024           # 2 x 9.2 MiB f32 x-buffers + weights + out ~= 21 MiB of VMEM


def _round_up(x, m):
    return ((x + m - 1) // m) * m


def _choose_tile_b(B):
    """Pick the batch tile.

    - B <= 32: a single full-array block (block dims == array dims, always layout-legal).
    - Otherwise: a multiple of 16 giving at least 2 grid steps (so v7x's two TensorCores both
      get work and the x DMA pipelines), capped at MAX_TILE_B.
    """
    if B <= 32:
        return B
    return min(MAX_TILE_B, _round_up(pl.cdiv(B, 2), 16))


def _mlp_kernel(x_ref, w1_ref, b1_ref, w2_ref, b2_ref, w3_ref, b3_ref,
                wc_ref, bc_ref, out_ref):
    # x arrives in its native dtype; cast to bf16 here (cheap VPU op, hidden under the x DMA).
    # The 1/255 input scale is already folded into w1, and 0..255 values are bf16-exact.
    x = x_ref[...].astype(jnp.bfloat16)

    h = jnp.dot(x, w1_ref[...], preferred_element_type=jnp.float32) + b1_ref[...]
    h = jnp.maximum(h, 0.0).astype(jnp.bfloat16)

    h = jnp.dot(h, w2_ref[...], preferred_element_type=jnp.float32) + b2_ref[...]
    h = jnp.maximum(h, 0.0).astype(jnp.bfloat16)

    h = jnp.dot(h, w3_ref[...], preferred_element_type=jnp.float32) + b3_ref[...]
    h = jnp.maximum(h, 0.0).astype(jnp.bfloat16)

    logits = jnp.dot(h, wc_ref[...], preferred_element_type=jnp.float32) + bc_ref[...]
    out_ref[...] = logits.astype(out_ref.dtype)   # bf16, lane-dense 128-wide store


def prepare_params(raw_params):
    """Pad to lane-dense shapes, fold 1/255 into w1, cast weights to bf16, biases to f32.

    raw_params: (w1, b1, w2, b2, w3, b3, wc, bc) with weights in (in_features, out_features)
    layout and biases as 1-D (out_features,) float32 arrays (torch-equivalent values).
    """
    w1, b1, w2, b2, w3, b3, wc, bc = raw_params

    w1p = jnp.zeros((IN_FEATURES, H_PAD), jnp.float32).at[:, :HIDDEN].set(w1 / 255.0)
    b1p = jnp.zeros((1, H_PAD), jnp.float32).at[0, :HIDDEN].set(b1)

    w2p = jnp.zeros((H_PAD, H_PAD), jnp.float32).at[:HIDDEN, :HIDDEN].set(w2)
    b2p = jnp.zeros((1, H_PAD), jnp.float32).at[0, :HIDDEN].set(b2)

    w3p = jnp.zeros((H_PAD, H_PAD), jnp.float32).at[:HIDDEN, :HIDDEN].set(w3)
    b3p = jnp.zeros((1, H_PAD), jnp.float32).at[0, :HIDDEN].set(b3)

    wcp = jnp.zeros((H_PAD, C_PAD), jnp.float32).at[:HIDDEN, :NUM_CLASS].set(wc)
    bcp = jnp.zeros((1, C_PAD), jnp.float32).at[0, :NUM_CLASS].set(bc)

    return (w1p.astype(jnp.bfloat16), b1p,
            w2p.astype(jnp.bfloat16), b2p,
            w3p.astype(jnp.bfloat16), b3p,
            wcp.astype(jnp.bfloat16), bcp)


@jax.jit
def mlp_forward(x, prepared_params):
    """x: (B, 3, 28, 28) float32 or uint8 image tensor (0..255). Returns logits (B, NUM_CLASS) f32."""
    B = x.shape[0]
    # Flatten exactly like torch's x.view(B, -1); this is a view / bitcast, not an HBM pass.
    x_flat = x.reshape(B, IN_FEATURES)

    tile_b = _choose_tile_b(B)
    grid = (pl.cdiv(B, tile_b),)

    w1, b1, w2, b2, w3, b3, wc, bc = prepared_params

    in_specs = [
        pl.BlockSpec((tile_b, IN_FEATURES), lambda i: (i, 0)),   # x: streamed per batch tile
        pl.BlockSpec((IN_FEATURES, H_PAD), lambda i: (0, 0)),    # w1 (resident)
        pl.BlockSpec((1, H_PAD), lambda i: (0, 0)),              # b1
        pl.BlockSpec((H_PAD, H_PAD), lambda i: (0, 0)),          # w2
        pl.BlockSpec((1, H_PAD), lambda i: (0, 0)),              # b2
        pl.BlockSpec((H_PAD, H_PAD), lambda i: (0, 0)),          # w3
        pl.BlockSpec((1, H_PAD), lambda i: (0, 0)),              # b3
        pl.BlockSpec((H_PAD, C_PAD), lambda i: (0, 0)),          # wc
        pl.BlockSpec((1, C_PAD), lambda i: (0, 0)),              # bc
    ]
    out_specs = pl.BlockSpec((tile_b, C_PAD), lambda i: (i, 0))

    flops_per_row = 2 * (IN_FEATURES * H_PAD + 2 * H_PAD * H_PAD + H_PAD * C_PAD)
    weight_bytes = 2 * (IN_FEATURES * H_PAD + 2 * H_PAD * H_PAD + H_PAD * C_PAD) \
        + 4 * (3 * H_PAD + C_PAD)
    cost = pl.CostEstimate(
        flops=flops_per_row * B,
        transcendentals=0,
        bytes_accessed=B * IN_FEATURES * x_flat.dtype.itemsize + weight_bytes + B * C_PAD * 2,
    )

    logits_pad = pl.pallas_call(
        _mlp_kernel,
        out_shape=jax.ShapeDtypeStruct((B, C_PAD), jnp.bfloat16),
        grid=grid,
        in_specs=in_specs,
        out_specs=out_specs,
        compiler_params=pltpu.CompilerParams(
            dimension_semantics=("parallel",),        # shard batch tiles across v7x's 2 TCs
            vmem_limit_bytes=48 * 1024 * 1024,        # headroom over v5e's 16 MiB scoped default
        ),
        cost_estimate=cost,
    )(x_flat, w1, b1, w2, b2, w3, b3, wc, bc)

    return logits_pad[:, :NUM_CLASS].astype(jnp.float32)


def init_params(key):
    """Deterministic torch.nn.Linear-style init; weights stored as (in_features, out_features)."""
    ks = jax.random.split(key, 8)

    def linear(kw, kb, fan_in, fan_out):
        bound = 1.0 / jnp.sqrt(jnp.float32(fan_in))
        w = jax.random.uniform(kw, (fan_in, fan_out), jnp.float32, -bound, bound)
        b = jax.random.uniform(kb, (fan_out,), jnp.float32, -bound, bound)
        return w, b

    w1, b1 = linear(ks[0], ks[1], IN_FEATURES, HIDDEN)
    w2, b2 = linear(ks[2], ks[3], HIDDEN, HIDDEN)
    w3, b3 = linear(ks[4], ks[5], HIDDEN, HIDDEN)
    wc, bc = linear(ks[6], ks[7], HIDDEN, NUM_CLASS)
    return (w1, b1, w2, b2, w3, b3, wc, bc)


def reference_forward_f32(x, raw_params):
    """Plain-JAX f32 reference of the PyTorch forward (return_feat=False)."""
    w1, b1, w2, b2, w3, b3, wc, bc = raw_params
    h = x.reshape(x.shape[0], -1) / 255.0
    h = jnp.maximum(h @ w1 + b1, 0.0)
    h = jnp.maximum(h @ w2 + b2, 0.0)
    h = jnp.maximum(h @ w3 + b3, 0.0)
    return h @ wc + bc


def reference_forward_prepared(x, prepared_params):
    """Plain-JAX reference that follows the exact dtype path of the kernel (bf16 MXU, f32 acc, bf16 store)."""
    w1, b1, w2, b2, w3, b3, wc, bc = prepared_params
    h = x.reshape(x.shape[0], IN_FEATURES).astype(jnp.bfloat16)
    h = jnp.maximum(jnp.dot(h, w1, preferred_element_type=jnp.float32) + b1, 0.0).astype(jnp.bfloat16)
    h = jnp.maximum(jnp.dot(h, w2, preferred_element_type=jnp.float32) + b2, 0.0).astype(jnp.bfloat16)
    h = jnp.maximum(jnp.dot(h, w3, preferred_element_type=jnp.float32) + b3, 0.0).astype(jnp.bfloat16)
    logits = jnp.dot(h, wc, preferred_element_type=jnp.float32) + bc
    return logits.astype(jnp.bfloat16).astype(jnp.float32)[:, :NUM_CLASS]


if __name__ == "__main__":
    key = jax.random.PRNGKey(0)
    k_x, k_p = jax.random.split(key)

    B = 2
    x = jax.random.uniform(k_x, (B, 3, 28, 28), jnp.float32, 0.0, 255.0)

    raw_params = init_params(k_p)
    prepared = prepare_params(raw_params)

    out = mlp_forward(x, prepared)
    out = jax.block_until_ready(out)
    assert out.shape == (B, NUM_CLASS), out.shape

    # Bit-path reference (same bf16/f32 math and bf16 store as the kernel): should match tightly.
    ref_exact = reference_forward_prepared(x, prepared)
    assert jnp.allclose(out, ref_exact, atol=1e-2, rtol=1e-2), "mismatch vs bf16-path reference"

    # Torch-semantics f32 reference: looser tolerance accounts for bf16 weights/activations/output.
    ref_f32 = reference_forward_f32(x, raw_params)
    assert jnp.allclose(out, ref_f32, atol=5e-2, rtol=5e-2), "mismatch vs f32 reference"

    print("KERNEL_OK")
</pallas_src>

<mosaic_0001>
module attributes {stable_mosaic.version = 11 : i64} {
  func.func @_mlp_kernel(%arg0: i32, %arg1: memref<2x2352xf32, #tpu.memory_space<vmem>>, %arg2: memref<2352x128xbf16, #tpu.memory_space<vmem>>, %arg3: memref<1x128xf32, #tpu.memory_space<vmem>>, %arg4: memref<128x128xbf16, #tpu.memory_space<vmem>>, %arg5: memref<1x128xf32, #tpu.memory_space<vmem>>, %arg6: memref<128x128xbf16, #tpu.memory_space<vmem>>, %arg7: memref<1x128xf32, #tpu.memory_space<vmem>>, %arg8: memref<128x128xbf16, #tpu.memory_space<vmem>>, %arg9: memref<1x128xf32, #tpu.memory_space<vmem>>, %arg10: memref<2x128xbf16, #tpu.memory_space<vmem>>) attributes {dimension_semantics = [#tpu.dimension_semantics<parallel>], iteration_bounds = array<i64: 1>, scalar_prefetch = 0 : i64, scratch_operands = 0 : i64, tpu.core_type = #tpu.core_type<tc>, window_params = [{transform_indices = @transform_0, window_bounds = array<i64: 2, 2352>}, {pipeline_mode = #tpu.pipeline_mode<synchronous>, transform_indices = @transform_1, window_bounds = array<i64: 2352, 128>}, {pipeline_mode = #tpu.pipeline_mode<synchronous>, transform_indices = @transform_2, window_bounds = array<i64: 1, 128>}, {pipeline_mode = #tpu.pipeline_mode<synchronous>, transform_indices = @transform_3, window_bounds = array<i64: 128, 128>}, {pipeline_mode = #tpu.pipeline_mode<synchronous>, transform_indices = @transform_4, window_bounds = array<i64: 1, 128>}, {pipeline_mode = #tpu.pipeline_mode<synchronous>, transform_indices = @transform_5, window_bounds = array<i64: 128, 128>}, {pipeline_mode = #tpu.pipeline_mode<synchronous>, transform_indices = @transform_6, window_bounds = array<i64: 1, 128>}, {pipeline_mode = #tpu.pipeline_mode<synchronous>, transform_indices = @transform_7, window_bounds = array<i64: 128, 128>}, {pipeline_mode = #tpu.pipeline_mode<synchronous>, transform_indices = @transform_8, window_bounds = array<i64: 1, 128>}, {transform_indices = @transform_9, window_bounds = array<i64: 2, 128>}]} {
    %c0 = arith.constant 0 : index
    %c0_0 = arith.constant 0 : index
    %0 = vector.load %arg1[%c0, %c0_0] : memref<2x2352xf32, #tpu.memory_space<vmem>>, vector<2x2352xf32>
    %1 = arith.truncf %0 : vector<2x2352xf32> to vector<2x2352xbf16>
    %c0_1 = arith.constant 0 : index
    %c0_2 = arith.constant 0 : index
    %2 = vector.load %arg2[%c0_1, %c0_2] : memref<2352x128xbf16, #tpu.memory_space<vmem>>, vector<2352x128xbf16>
    %cst = arith.constant dense<0.000000e+00> : vector<2x128xf32>
    %3 = tpu.matmul %1, %2, %cst {dimension_numbers = #tpu.dot_dimension_numbers<[1], [0], [0], [1], [0, 0, 1, 1], [], []>} : vector<2x2352xbf16>, vector<2352x128xbf16>, vector<2x128xf32> -> vector<2x128xf32>
    %c0_3 = arith.constant 0 : index
    %c0_4 = arith.constant 0 : index
    %4 = vector.load %arg3[%c0_3, %c0_4] : memref<1x128xf32, #tpu.memory_space<vmem>>, vector<1x128xf32>
    %5 = vector.broadcast %4 : vector<1x128xf32> to vector<2x128xf32>
    %6 = arith.addf %3, %5 : vector<2x128xf32>
    %cst_5 = arith.constant 0.000000e+00 : f32
    %7 = vector.broadcast %cst_5 : f32 to vector<2x128xf32>
    %8 = arith.maximumf %6, %7 : vector<2x128xf32>
    %9 = arith.truncf %8 : vector<2x128xf32> to vector<2x128xbf16>
    %c0_6 = arith.constant 0 : index
    %c0_7 = arith.constant 0 : index
    %10 = vector.load %arg4[%c0_6, %c0_7] : memref<128x128xbf16, #tpu.memory_space<vmem>>, vector<128x128xbf16>
    %cst_8 = arith.constant dense<0.000000e+00> : vector<2x128xf32>
    %11 = tpu.matmul %9, %10, %cst_8 {dimension_numbers = #tpu.dot_dimension_numbers<[1], [0], [0], [1], [0, 0, 1, 1], [], []>} : vector<2x128xbf16>, vector<128x128xbf16>, vector<2x128xf32> -> vector<2x128xf32>
    %c0_9 = arith.constant 0 : index
    %c0_10 = arith.constant 0 : index
    %12 = vector.load %arg5[%c0_9, %c0_10] : memref<1x128xf32, #tpu.memory_space<vmem>>, vector<1x128xf32>
    %13 = vector.broadcast %12 : vector<1x128xf32> to vector<2x128xf32>
    %14 = arith.addf %11, %13 : vector<2x128xf32>
    %cst_11 = arith.constant 0.000000e+00 : f32
    %15 = vector.broadcast %cst_11 : f32 to vector<2x128xf32>
    %16 = arith.maximumf %14, %15 : vector<2x128xf32>
    %17 = arith.truncf %16 : vector<2x128xf32> to vector<2x128xbf16>
    %c0_12 = arith.constant 0 : index
    %c0_13 = arith.constant 0 : index
    %18 = vector.load %arg6[%c0_12, %c0_13] : memref<128x128xbf16, #tpu.memory_space<vmem>>, vector<128x128xbf16>
    %cst_14 = arith.constant dense<0.000000e+00> : vector<2x128xf32>
    %19 = tpu.matmul %17, %18, %cst_14 {dimension_numbers = #tpu.dot_dimension_numbers<[1], [0], [0], [1], [0, 0, 1, 1], [], []>} : vector<2x128xbf16>, vector<128x128xbf16>, vector<2x128xf32> -> vector<2x128xf32>
    %c0_15 = arith.constant 0 : index
    %c0_16 = arith.constant 0 : index
    %20 = vector.load %arg7[%c0_15, %c0_16] : memref<1x128xf32, #tpu.memory_space<vmem>>, vector<1x128xf32>
    %21 = vector.broadcast %20 : vector<1x128xf32> to vector<2x128xf32>
    %22 = arith.addf %19, %21 : vector<2x128xf32>
    %cst_17 = arith.constant 0.000000e+00 : f32
    %23 = vector.broadcast %cst_17 : f32 to vector<2x128xf32>
    %24 = arith.maximumf %22, %23 : vector<2x128xf32>
    %25 = arith.truncf %24 : vector<2x128xf32> to vector<2x128xbf16>
    %c0_18 = arith.constant 0 : index
    %c0_19 = arith.constant 0 : index
    %26 = vector.load %arg8[%c0_18, %c0_19] : memref<128x128xbf16, #tpu.memory_space<vmem>>, vector<128x128xbf16>
    %cst_20 = arith.constant dense<0.000000e+00> : vector<2x128xf32>
    %27 = tpu.matmul %25, %26, %cst_20 {dimension_numbers = #tpu.dot_dimension_numbers<[1], [0], [0], [1], [0, 0, 1, 1], [], []>} : vector<2x128xbf16>, vector<128x128xbf16>, vector<2x128xf32> -> vector<2x128xf32>
    %c0_21 = arith.constant 0 : index
    %c0_22 = arith.constant 0 : index
    %28 = vector.load %arg9[%c0_21, %c0_22] : memref<1x128xf32, #tpu.memory_space<vmem>>, vector<1x128xf32>
    %29 = vector.broadcast %28 : vector<1x128xf32> to vector<2x128xf32>
    %30 = arith.addf %27, %29 : vector<2x128xf32>
    %31 = arith.truncf %30 : vector<2x128xf32> to vector<2x128xbf16>
    %c0_23 = arith.constant 0 : index
    %c0_24 = arith.constant 0 : index
    %32 = vector.load %arg10[%c0_23, %c0_24] : memref<2x128xbf16, #tpu.memory_space<vmem>>, vector<2x128xbf16>
    tpu.vector_store %arg10[%c0_23, %c0_24], %31 {strides = array<i32>} : memref<2x128xbf16, #tpu.memory_space<vmem>>, vector<2x128xbf16>,
    return
  }
  func.func @transform_0(%arg0: i32) -> (i32, i32) {
    %c0_i32 = arith.constant 0 : i32
    %c0_i32_0 = arith.constant 0 : i32
    return %arg0, %c0_i32 : i32, i32
  }
  func.func @transform_1(%arg0: i32) -> (i32, i32) {
    %c0_i32 = arith.constant 0 : i32
    %c0_i32_0 = arith.constant 0 : i32
    %c0_i32_1 = arith.constant 0 : i32
    return %c0_i32, %c0_i32_0 : i32, i32
  }
  func.func @transform_2(%arg0: i32) -> (i32, i32) {
    %c0_i32 = arith.constant 0 : i32
    %c0_i32_0 = arith.constant 0 : i32
    %c0_i32_1 = arith.constant 0 : i32
    return %c0_i32, %c0_i32_0 : i32, i32
  }
  func.func @transform_3(%arg0: i32) -> (i32, i32) {
    %c0_i32 = arith.constant 0 : i32
    %c0_i32_0 = arith.constant 0 : i32
    %c0_i32_1 = arith.constant 0 : i32
    return %c0_i32, %c0_i32_0 : i32, i32
  }
  func.func @transform_4(%arg0: i32) -> (i32, i32) {
    %c0_i32 = arith.constant 0 : i32
    %c0_i32_0 = arith.constant 0 : i32
    %c0_i32_1 = arith.constant 0 : i32
    return %c0_i32, %c0_i32_0 : i32, i32
  }
  func.func @transform_5(%arg0: i32) -> (i32, i32) {
    %c0_i32 = arith.constant 0 : i32
    %c0_i32_0 = arith.constant 0 : i32
    %c0_i32_1 = arith.constant 0 : i32
    return %c0_i32, %c0_i32_0 : i32, i32
  }
  func.func @transform_6(%arg0: i32) -> (i32, i32) {
    %c0_i32 = arith.constant 0 : i32
    %c0_i32_0 = arith.constant 0 : i32
    %c0_i32_1 = arith.constant 0 : i32
    return %c0_i32, %c0_i32_0 : i32, i32
  }
  func.func @transform_7(%arg0: i32) -> (i32, i32) {
    %c0_i32 = arith.constant 0 : i32
    %c0_i32_0 = arith.constant 0 : i32
    %c0_i32_1 = arith.constant 0 : i32
    return %c0_i32, %c0_i32_0 : i32, i32
  }
  func.func @transform_8(%arg0: i32) -> (i32, i32) {
    %c0_i32 = arith.constant 0 : i32
    %c0_i32_0 = arith.constant 0 : i32
    %c0_i32_1 = arith.constant 0 : i32
    return %c0_i32, %c0_i32_0 : i32, i32
  }
  func.func @transform_9(%arg0: i32) -> (i32, i32) {
    %c0_i32 = arith.constant 0 : i32
    %c0_i32_0 = arith.constant 0 : i32
    return %arg0, %c0_i32 : i32, i32
  }
}

</mosaic_0001>

<bundles_post_ra>
// kernel: mlp_forward.1
= control target key start
LH: loop header
LB: loop body
LE: loop exit
PB: predicated region body
PF: predicated region fallthrough
CT: control target
= control target key end

     0   :  { %14 = vsyncpa [#allocation3], 0  ;;  %s2793_s30 = smov [#allocation2]   ;;  %s3011_s0 = inlined_call_operand.vmem [shape: f32[2,2352], index: 0, kind: input, shape index: {}]   ;;  %s3012_s1 = inlined_call_operand.hbm [shape: bf16[2352,128], index: 1, kind: input, shape index: {}]   ;;  %s3013_s2 = inlined_call_operand.vmem [shape: f32[1,128], index: 2, kind: input, shape index: {}]   ;;  %s3014_s3 = inlined_call_operand.vmem [shape: bf16[128,128], index: 3, kind: input, shape index: {}]   ;;  %s3015_s4 = inlined_call_operand.vmem [shape: f32[1,128], index: 4, kind: input, shape index: {}]   ;;  %s3016_s5 = inlined_call_operand.vmem [shape: bf16[128,128], index: 5, kind: input, shape index: {}]   ;;  %s3017_s6 = inlined_call_operand.vmem [shape: f32[1,128], index: 6, kind: input, shape index: {}]   ;;  %s3018_s7 = inlined_call_operand.vmem [shape: bf16[128,128], index: 7, kind: input, shape index: {}]   ;;  %s3019_s8 = inlined_call_operand.vmem [shape: f32[1,128], index: 8, kind: input, shape index: {}]   ;;  %s3020_s9 = inlined_call_operand.vmem [shape: bf16[2,128], index: 9, kind: output, shape index: {}]  }
   0x1   :  { %s22_s10 = sshll.u32 %s2793_s30, 4  ;;  %s2769_s13 = scalar_lea.hbm %s3012_s1, 18816  ;;  %s23_s10 = int_to_ptr.vmem [resolvable:$true] %s22_s10 }
   0x2   :  { %p2770_p0 = scmp.ne.s32.totalorder %s3012_s1, %s2769_s13  ;;  %p2773_p1 = scmp.lt.u32.totalorder %s2769_s13, %s3012_s1 }
   0x4   :  { %p2775_p2 = pnand %p2773_p1, %p2770_p0 }
   0x6   :  { %2778 = shalt.err (!%p2775_p2)
}
   0x7   :  { %s2779_s18 = scalar_lea.vmem %s23_s10, 18816  ;;  %p2784_p4 = scmp.lt.s32.totalorder %s23_s10, %s23_s10 }
   0x8   :  { %p2780_p3 = scmp.ne.s32.totalorder %s23_s10, %s2779_s18  ;;  %p2785_p5 = scmp.lt.s32.totalorder %s2779_s18, %s2779_s18 }
   0xa   :  { %p2786_p6 = por %p2785_p5, %p2784_p4 }
   0xc   :  { %p2787_p7 = pnand %p2786_p6, %p2780_p3 }
   0xe   :  { %2790 = shalt.err (!%p2787_p7)
}
   0xf   :  { %s2794_s19 = smov 64   ;;  %s2795_s20 = smov 4  }
  0x10   :  { %28 = dma.hbm_to_vmem [thread:$0]  %s3012_s1, 18816, %s23_s10, [#allocation3], %s2794_s19, %s2794_s19, %s2795_s20  }
  0x11   :  { %2791 = dma.done.wait [#allocation3], 18816  }
  0x12   :  { %2792 = vsyncadd [#allocation3], 4294948480  ;;  %v2593_v0 = vld [vmem:[#allocation2 + $0x40] sm:$0xff]   ;;  %v2597_v4 = vld [vmem:[#allocation2 + $0x48] sm:$0xff]   ;;  %v2796_v21 = vmov 1983009808   ;;  %v61_v23 = vlaneseq }
  0x13   :  { %v2594_v1 = vld [vmem:[#allocation2] sm:$0xff]   ;;  %2288 = vmatprep.subr.bf16.mxu0 %v2593_v0  ;;  %v2598_v5 = vld [vmem:[#allocation2 + $0x8] sm:$0xff]   ;;  %v2601_v8 = vld [vmem:[#allocation2 + $0x50] sm:$0xff]   ;;  %v59_v22 = vunpack.c.l.s4 %v2796_v21  ;;  %vm2798_vm0 = vmmov 0   ;;  %vm1362_vm1 = vcmask 392192  }
  0x14   :  { %v2595_v2 = vld [vmem:[#allocation2 + $0xc0] sm:$0xff]   ;;  %2289 = vmatpush3.bf16.msra.mxu0 %v2594_v1  ;;  %v2599_v6 = vld [vmem:[#allocation2 + $0xc8] sm:$0xff]   ;;  %v2602_v9 = vld [vmem:[#allocation2 + $0x10] sm:$0xff]   ;;  %v62_v29 = vshrl.u32 %v61_v23, 7 }
  0x15   :  { %v2596_v3 = vld [vmem:[#allocation2 + $0x80] sm:$0xff]   ;;  %2310 = vmatprep.subr.bf16.mxu1 %v2595_v2  ;;  %2290 = vmatprep.subr.bf16.mxu0 %v2597_v4  ;;  %v2600_v7 = vld [vmem:[#allocation2 + $0x88] sm:$0xff]   ;;  %v2603_v10 = vld [vmem:[#allocation2 + $0xd0] sm:$0xff]   ;;  %v60_v28 = vunpack.c.0.s8 %v59_v22 }
  0x16   :  { %2311 = vmatpush3.bf16.msra.mxu1 %v2596_v3  ;;  %v2604_v11 = vld [vmem:[#allocation2 + $0x90] sm:$0xff]   ;;  %v2605_v12 = vld [vmem:[#allocation2 + $0x58] sm:$0xff]   ;;  %v2609_v16 = vld [vmem:[#allocation2 + $0x60] sm:$0xff]  }
  0x17   :  { %2312 = vmatprep.subr.bf16.mxu1 %v2599_v6  ;;  %v2606_v13 = vld [vmem:[#allocation2 + $0x18] sm:$0xff]   ;;  %v2610_v17 = vld [vmem:[#allocation2 + $0x20] sm:$0xff]   ;;  %v2613_v20 = vld [vmem:[#allocation2 + $0x68] sm:$0xff]   ;;  %v2861_v34 = vsub.s32 %v60_v28, %v62_v29 }
  0x18   :  { %2291 = vmatpush3.bf16.msra.mxu0 %v2598_v5  ;;  %v2607_v14 = vld [vmem:[#allocation2 + $0xd8] sm:$0xff]   ;;  %v2611_v18 = vld [vmem:[#allocation2 + $0xe0] sm:$0xff]   ;;  %v2614_v24 = vld [vmem:[#allocation2 + $0x28] sm:$0xff]  }
  0x19   :  { %2292 = vmatprep.subr.bf16.mxu0 %v2601_v8  ;;  %v2608_v15 = vld [vmem:[#allocation2 + $0x98] sm:$0xff]   ;;  %v2612_v19 = vld [vmem:[#allocation2 + $0xa0] sm:$0xff]   ;;  %v2615_v25 = vld [vmem:[#allocation2 + $0xe8] sm:$0xff]  }
  0x1a   :  { %2313 = vmatpush3.bf16.msra.mxu1 %v2600_v7  ;;  %v2616_v26 = vld [vmem:[#allocation2 + $0xa8] sm:$0xff]   ;;  %v2617_v27 = vld [vmem:[#allocation2 + $0x70] sm:$0xff]   ;;  %v2621_v33 = vld [vmem:[#allocation2 + $0x78] sm:$0xff]  }
  0x1b   :  { %2314 = vmatprep.subr.bf16.mxu1 %v2603_v10  ;;  %v2618_v30 = vld [vmem:[#allocation2 + $0x30] sm:$0xff]   ;;  %v2622_v35 = vld [vmem:[#allocation2 + $0x38] sm:$0xff]   ;;  %v47_v37 = vld [vmem:[%s3011_s0] sm:$0xff] }
  0x1c   :  { %2293 = vmatpush3.bf16.msra.mxu0 %v2602_v9  ;;  %v2619_v31 = vld [vmem:[#allocation2 + $0xf0] sm:$0xff]   ;;  %v2623_v36 = vld [vmem:[#allocation2 + $0xf8] sm:$0xff]   ;;  %v64_v38 = vrot.slane %v47_v37, %v2861_v34  ;;  %v57_v40 = vcombine.high %v47_v37, %v47_v37  ;;  %v2625_v41 = vld [vmem:[#allocation2 + $0x140] sm:$0xff]  }
  0x1d   :  { %2294 = vmatprep.subr.bf16.mxu0 %v2605_v12  ;;  %v2620_v32 = vld [vmem:[#allocation2 + $0xb0] sm:$0xff]   ;;  %v2624_v39 = vld [vmem:[#allocation2 + $0xb8] sm:$0xff]   ;;  %v2627_v44 = vld [vmem:[#allocation2 + $0x100] sm:$0xff]  }
  0x1e   :  { %2315 = vmatpush3.bf16.msra.mxu1 %v2604_v11  ;;  %v72_v42 = vcombine.high %v64_v38, %v64_v38  ;;  %v71_v43 = vrot.slane %v57_v40, %v2861_v34  ;;  %v160_v45 = vpack.c.bf16 %v64_v38, %v64_v38  ;;  %v2628_v46 = vld [vmem:[#allocation2 + $0x1c0] sm:$0xff]   ;;  %v2630_v51 = vld [vmem:[#allocation2 + $0x148] sm:$0xff]   ;;  %v2634_v56 = vld [vmem:[#allocation2 + $0x150] sm:$0xff]  }
  0x1f   :  { %2316 = vmatprep.subr.bf16.mxu1 %v2607_v14  ;;  %v2629_v49 = vld [vmem:[#allocation2 + $0x180] sm:$0xff]   ;;  %v2631_v53 = vld [vmem:[#allocation2 + $0x108] sm:$0xff]   ;;  %v2635_v57 = vld [vmem:[#allocation2 + $0x110] sm:$0xff]  }
  0x20   :  { %2295 = vmatpush3.bf16.msra.mxu0 %v2606_v13  ;;  %v161_v47 = vpack.c.bf16 %v72_v42, %v72_v42  ;;  %v73_v48 = vcombine.high %v71_v43, %v71_v43  ;;  %v162_v50 = vpack.c.bf16 %v71_v43, %v71_v43  ;;  %v2632_v54 = vld [vmem:[#allocation2 + $0x1c8] sm:$0xff]   ;;  %v2636_v58 = vld [vmem:[#allocation2 + $0x1d0] sm:$0xff]   ;;  %v2638_v60 = vld [vmem:[#allocation2 + $0x158] sm:$0xff]  }
  0x21   :  { %2296 = vmatprep.subr.bf16.mxu0 %v2609_v16  ;;  %v2633_v55 = vld [vmem:[#allocation2 + $0x188] sm:$0xff]   ;;  %v2637_v59 = vld [vmem:[#allocation2 + $0x190] sm:$0xff]   ;;  %v2639_v61 = vld [vmem:[#allocation2 + $0x118] sm:$0xff]  }
  0x22   :  { %2317 = vmatpush3.bf16.msra.mxu1 %v2608_v15  ;;  %1398 = vmatprep.mubr.bf16.mxu0 %v161_v47  ;;  %v163_v52 = vpack.c.bf16 %v73_v48, %v73_v48  ;;  %v2640_v62 = vld [vmem:[#allocation2 + $0x1d8] sm:$0xff]   ;;  %v2642_v0 = vld [vmem:[#allocation2 + $0x160] sm:$0xff]   ;;  %v2646_v4 = vld [vmem:[#allocation2 + $0x168] sm:$0xff]  }
  0x23   :  { %2318 = vmatprep.subr.bf16.mxu1 %v2611_v18  ;;  %v2641_v63 = vld [vmem:[#allocation2 + $0x198] sm:$0xff]   ;;  %v2643_v1 = vld [vmem:[#allocation2 + $0x120] sm:$0xff]   ;;  %v2647_v5 = vld [vmem:[#allocation2 + $0x128] sm:$0xff]  }
  0x24   :  { %2297 = vmatpush3.bf16.msra.mxu0 %v2610_v17  ;;  %1438 = vmatprep.mubr.bf16.mxu1 %v163_v52  ;;  %v2644_v2 = vld [vmem:[#allocation2 + $0x1e0] sm:$0xff]   ;;  %v2648_v6 = vld [vmem:[#allocation2 + $0x1e8] sm:$0xff]   ;;  %v2650_v8 = vld [vmem:[#allocation2 + $0x170] sm:$0xff]  }
  0x25   :  { %2298 = vmatprep.subr.bf16.mxu0 %v2613_v20  ;;  %v2645_v3 = vld [vmem:[#allocation2 + $0x1a0] sm:$0xff]   ;;  %v2649_v7 = vld [vmem:[#allocation2 + $0x1a8] sm:$0xff]   ;;  %v2651_v9 = vld [vmem:[#allocation2 + $0x130] sm:$0xff]  }
  0x26   :  { %2319 = vmatpush3.bf16.msra.mxu1 %v2612_v19  ;;  %v2652_v10 = vld [vmem:[#allocation2 + $0x1f0] sm:$0xff]   ;;  %v2654_v12 = vld [vmem:[#allocation2 + $0x178] sm:$0xff]   ;;  %v48_v15 = vld [vmem:[%s3011_s0 + $0x8] sm:$0xff] }
  0x27   :  { %2320 = vmatprep.subr.bf16.mxu1 %v2615_v25  ;;  %v2653_v11 = vld [vmem:[#allocation2 + $0x1b0] sm:$0xff]   ;;  %v2655_v13 = vld [vmem:[#allocation2 + $0x138] sm:$0xff]   ;;  %v81_v16 = vrot.slane %v48_v15, %v2861_v34  ;;  %v74_v18 = vcombine.high %v48_v15, %v48_v15  ;;  %v2658_v19 = vld [vmem:[#allocation2 + $0x240] sm:$0xff]  }
  0x28   :  { %2299 = vmatpush3.bf16.msra.mxu0 %v2614_v24  ;;  %v2656_v14 = vld [vmem:[#allocation2 + $0x1f8] sm:$0xff]   ;;  %v2660_v22 = vld [vmem:[#allocation2 + $0x200] sm:$0xff]   ;;  %v2663_v29 = vld [vmem:[#allocation2 + $0x248] sm:$0xff]  }
  0x29   :  { %2300 = vmatprep.subr.bf16.mxu0 %v2617_v27  ;;  %v2657_v17 = vld [vmem:[#allocation2 + $0x1b8] sm:$0xff]   ;;  %v89_v20 = vcombine.high %v81_v16, %v81_v16  ;;  %v88_v21 = vrot.slane %v74_v18, %v2861_v34  ;;  %v164_v23 = vpack.c.bf16 %v81_v16, %v81_v16  ;;  %v2661_v24 = vld [vmem:[#allocation2 + $0x2c0] sm:$0xff]   ;;  %v2669_v37 = vld [vmem:[#allocation2 + $0x2d0] sm:$0xff]  }
  0x2a   :  { %2321 = vmatpush3.bf16.msra.mxu1 %v2616_v26  ;;  %v2662_v27 = vld [vmem:[#allocation2 + $0x280] sm:$0xff]   ;;  %v2670_v38 = vld [vmem:[#allocation2 + $0x290] sm:$0xff]   ;;  %v2672_v40 = vld [vmem:[#allocation2 + $0x218] sm:$0xff]  }
  0x2b   :  { %2322 = vmatprep.subr.bf16.mxu1 %v2619_v31  ;;  %v165_v25 = vpack.c.bf16 %v89_v20, %v89_v20  ;;  %v90_v26 = vcombine.high %v88_v21, %v88_v21  ;;  %v166_v28 = vpack.c.bf16 %v88_v21, %v88_v21  ;;  %v2664_v31 = vld [vmem:[#allocation2 + $0x208] sm:$0xff]   ;;  %v2674_v42 = vld [vmem:[#allocation2 + $0x298] sm:$0xff]   ;;  %v2675_v43 = vld [vmem:[#allocation2 + $0x260] sm:$0xff]  }
  0x2c   :  { %2301 = vmatpush3.bf16.msra.mxu0 %v2618_v30  ;;  %v2679_v47 = vld [vmem:[#allocation2 + $0x268] sm:$0xff]   ;;  %v2684_v52 = vld [vmem:[#allocation2 + $0x230] sm:$0xff]   ;;  %v2705_v18 = vld [vmem:[#allocation2 + $0x318] sm:$0xff]  }
  0x2d   :  { %2302 = vmatprep.subr.bf16.mxu0 %v2621_v33  ;;  %v167_v30 = vpack.c.bf16 %v90_v26, %v90_v26  ;;  %v2666_v33 = vld [vmem:[#allocation2 + $0x288] sm:$0xff]   ;;  %v2702_v15 = vld [vmem:[#allocation2 + $0x3d0] sm:$0xff]   ;;  %v2707_v20 = vld [vmem:[#allocation2 + $0x398] sm:$0xff]  }
  0x2e   :  { %2323 = vmatpush3.bf16.msra.mxu1 %v2620_v32  ;;  %v2665_v32 = vld [vmem:[#allocation2 + $0x2c8] sm:$0xff]   ;;  %v2703_v16 = vld [vmem:[#allocation2 + $0x390] sm:$0xff]   ;;  %v2708_v21 = vld [vmem:[#allocation2 + $0x360] sm:$0xff]  }
  0x2f   :  { %2324 = vmatprep.subr.bf16.mxu1 %v2623_v36  ;;  %v2668_v36 = vld [vmem:[#allocation2 + $0x210] sm:$0xff]   ;;  %v2680_v48 = vld [vmem:[#allocation2 + $0x228] sm:$0xff]  }
  0x30   :  { %2303 = vmatpush3.bf16.msra.mxu0 %v2622_v35  ;;  %v2667_v35 = vld [vmem:[#allocation2 + $0x250] sm:$0xff]   ;;  %v2713_v26 = vld [vmem:[#allocation2 + $0x328] sm:$0xff]  }
  0x31   :  { %2332 = vmatprep.subr.bf16.mxu0 %v2625_v41  ;;  %v2673_v41 = vld [vmem:[#allocation2 + $0x2d8] sm:$0xff]  }
  0x32   :  { %2325 = vmatpush3.bf16.msra.mxu1 %v2624_v39  ;;  %v2671_v39 = vld [vmem:[#allocation2 + $0x258] sm:$0xff]  }
  0x33   :  { %2354 = vmatprep.subr.bf16.mxu1 %v2628_v46  ;;  %1399 = vmatmul.mubr.bf16.vlgmr.msra.gmra.mrb[0].mxu0 %v160_v45  ;;  %v2677_v45 = vld [vmem:[#allocation2 + $0x2e0] sm:$0xff]  }
  0x34   :  { %2333 = vmatpush3.bf16.msra.mxu0 %v2627_v44  ;;  %1478 = vmatprep.mubr.bf16.mxu0 %v165_v25  ;;  %v2676_v44 = vld [vmem:[#allocation2 + $0x220] sm:$0xff]   ;;  %v2712_v25 = vld [vmem:[#allocation2 + $0x368] sm:$0xff]  }
  0x35   :  { %1439 = vmatmul.mubr.bf16.vlgmr.msra.gmra.mrb[0].mxu1 %v162_v50  ;;  %2334 = vmatprep.subr.bf16.mxu0 %v2630_v51  ;;  %v2678_v46 = vld [vmem:[#allocation2 + $0x2a0] sm:$0xff]   ;;  %v2682_v50 = vld [vmem:[#allocation2 + $0x2a8] sm:$0xff]   ;;  %v2683_v51 = vld [vmem:[#allocation2 + $0x270] sm:$0xff]  }
  0x36   :  { %2355 = vmatpush3.bf16.msra.mxu1 %v2629_v49  ;;  %1518 = vmatprep.mubr.bf16.mxu1 %v167_v30  ;;  %v2681_v49 = vld [vmem:[#allocation2 + $0x2e8] sm:$0xff]   ;;  %v2717_v30 = vld [vmem:[#allocation2 + $0x330] sm:$0xff]  }
  0x37   :  { %2356 = vmatprep.subr.bf16.mxu1 %v2632_v54  ;;  %v2686_v54 = vld [vmem:[#allocation2 + $0x2b0] sm:$0xff]  }
  0x38   :  { %2335 = vmatpush3.bf16.msra.mxu0 %v2631_v53  ;;  %v2685_v53 = vld [vmem:[#allocation2 + $0x2f0] sm:$0xff]  }
  0x39   :  { %2336 = vmatprep.subr.bf16.mxu0 %v2634_v56  ;;  %v2688_v56 = vld [vmem:[#allocation2 + $0x238] sm:$0xff]  }
  0x3a   :  { %2357 = vmatpush3.bf16.msra.mxu1 %v2633_v55  ;;  %v2687_v55 = vld [vmem:[#allocation2 + $0x278] sm:$0xff]  }
  0x3b   :  { %2358 = vmatprep.subr.bf16.mxu1 %v2636_v58  ;;  %v49_v58 = vld [vmem:[%s3011_s0 + $0x10] sm:$0xff] }
  0x3c   :  { %2337 = vmatpush3.bf16.msra.mxu0 %v2635_v57  ;;  %v2689_v57 = vld [vmem:[#allocation2 + $0x2f8] sm:$0xff]  }
  0x3d   :  { %2338 = vmatprep.subr.bf16.mxu0 %v2638_v60  ;;  %v2690_v60 = vld [vmem:[#allocation2 + $0x2b8] sm:$0xff]  }
  0x3e   :  { %2359 = vmatpush3.bf16.msra.mxu1 %v2637_v59  ;;  %v98_v59 = vrot.slane %v49_v58, %v2861_v34 }
  0x3f   :  { %2360 = vmatprep.subr.bf16.mxu1 %v2640_v62  ;;  %v2691_v62 = vld [vmem:[#allocation2 + $0x340] sm:$0xff]  }
  0x40   :  { %2339 = vmatpush3.bf16.msra.mxu0 %v2639_v61  ;;  %v91_v61 = vcombine.high %v49_v58, %v49_v58  ;;  %v2740_v58 = vld [vmem:[#allocation2 + $0x488] sm:$0xff]  }
  0x41   :  { %2340 = vmatprep.subr.bf16.mxu0 %v2642_v0 }
  0x42   :  { %2361 = vmatpush3.bf16.msra.mxu1 %v2641_v63  ;;  %v106_v63 = vcombine.high %v98_v59, %v98_v59  ;;  %v105_v0 = vrot.slane %v91_v61, %v2861_v34  ;;  %v51_v61 = vld [vmem:[%s3011_s0 + $0x20] sm:$0x3f] }
  0x43   :  { %2362 = vmatprep.subr.bf16.mxu1 %v2644_v2  ;;  %v168_v2 = vpack.c.bf16 %v98_v59, %v98_v59  ;;  %v2733_v59 = vld [vmem:[#allocation2 + $0x460] sm:$0xff]  }
  0x44   :  { %2341 = vmatpush3.bf16.msra.mxu0 %v2643_v1  ;;  %v2693_v1 = vld [vmem:[#allocation2 + $0x300] sm:$0xff]  }
  0x45   :  { %2342 = vmatprep.subr.bf16.mxu0 %v2646_v4  ;;  %v169_v4 = vpack.c.bf16 %v106_v63, %v106_v63  ;;  %v125_v63 = vcombine.high %v51_v61, %v51_v61 }
  0x46   :  { %2363 = vmatpush3.bf16.msra.mxu1 %v2645_v3  ;;  %v2694_v3 = vld [vmem:[#allocation2 + $0x3c0] sm:$0xff]  }
  0x47   :  { %2364 = vmatprep.subr.bf16.mxu1 %v2648_v6  ;;  %v2695_v6 = vld [vmem:[#allocation2 + $0x380] sm:$0xff]  }
  0x48   :  { %2343 = vmatpush3.bf16.msra.mxu0 %v2647_v5  ;;  %v107_v5 = vcombine.high %v105_v0, %v105_v0 }
  0x49   :  { %2344 = vmatprep.subr.bf16.mxu0 %v2650_v8  ;;  %v2696_v8 = vld [vmem:[#allocation2 + $0x348] sm:$0xff]  }
  0x4a   :  { %2365 = vmatpush3.bf16.msra.mxu1 %v2649_v7  ;;  %v170_v7 = vpack.c.bf16 %v105_v0, %v105_v0  ;;  %v132_v0 = vrot.slane %v51_v61, %v2861_v34 }
  0x4b   :  { %2366 = vmatprep.subr.bf16.mxu1 %v2652_v10  ;;  %v2697_v10 = vld [vmem:[#allocation2 + $0x308] sm:$0xff]  }
  0x4c   :  { %2345 = vmatpush3.bf16.msra.mxu0 %v2651_v9  ;;  %v171_v9 = vpack.c.bf16 %v107_v5, %v107_v5  ;;  %v2738_v5 = vld [vmem:[#allocation2 + $0x470] sm:$0xff]  }
  0x4d   :  { %2346 = vmatprep.subr.bf16.mxu0 %v2654_v12  ;;  %v2699_v12 = vld [vmem:[#allocation2 + $0x388] sm:$0xff]  }
  0x4e   :  { %2367 = vmatpush3.bf16.msra.mxu1 %v2653_v11  ;;  %v2698_v11 = vld [vmem:[#allocation2 + $0x3c8] sm:$0xff]  }
  0x4f   :  { %2368 = vmatprep.subr.bf16.mxu1 %v2656_v14  ;;  %v2701_v14 = vld [vmem:[#allocation2 + $0x310] sm:$0xff]  }
  0x50   :  { %2347 = vmatpush3.bf16.msra.mxu0 %v2655_v13  ;;  %v2700_v13 = vld [vmem:[#allocation2 + $0x350] sm:$0xff]  }
  0x51   :  { %2376 = vmatprep.subr.bf16.mxu0 %v2658_v19  ;;  %v2706_v19 = vld [vmem:[#allocation2 + $0x3d8] sm:$0xff]  }
  0x52   :  { %2369 = vmatpush3.bf16.msra.mxu1 %v2657_v17  ;;  %v2704_v17 = vld [vmem:[#allocation2 + $0x358] sm:$0xff]  }
  0x53   :  { %1479 = vmatmul.mubr.bf16.vlgmr.msra.gmra.mrb[4].mxu0 %v164_v23  ;;  %2398 = vmatprep.subr.bf16.mxu1 %v2661_v24  ;;  %v2710_v23 = vld [vmem:[#allocation2 + $0x3e0] sm:$0xff]  }
  0x54   :  { %2377 = vmatpush3.bf16.msra.mxu0 %v2660_v22  ;;  %1558 = vmatprep.mubr.bf16.mxu0 %v169_v4  ;;  %v2709_v22 = vld [vmem:[#allocation2 + $0x320] sm:$0xff]   ;;  %v2736_v4 = vld [vmem:[#allocation2 + $0x428] sm:$0xff]  }
  0x55   :  { %1519 = vmatmul.mubr.bf16.vlgmr.msra.gmra.mrb[4].mxu1 %v166_v28  ;;  %2378 = vmatprep.subr.bf16.mxu0 %v2663_v29  ;;  %v2711_v24 = vld [vmem:[#allocation2 + $0x3a0] sm:$0xff]   ;;  %v2715_v28 = vld [vmem:[#allocation2 + $0x3a8] sm:$0xff]   ;;  %v2716_v29 = vld [vmem:[#allocation2 + $0x370] sm:$0xff]  }
  0x56   :  { %2399 = vmatpush3.bf16.msra.mxu1 %v2662_v27  ;;  %1598 = vmatprep.mubr.bf16.mxu1 %v171_v9  ;;  %v2714_v27 = vld [vmem:[#allocation2 + $0x3e8] sm:$0xff]   ;;  %v2741_v9 = vld [vmem:[#allocation2 + $0x478] sm:$0xff]  }
  0x57   :  { %2400 = vmatprep.subr.bf16.mxu1 %v2665_v32  ;;  %v2719_v32 = vld [vmem:[#allocation2 + $0x3b0] sm:$0xff]  }
  0x58   :  { %2379 = vmatpush3.bf16.msra.mxu0 %v2664_v31  ;;  %v2718_v31 = vld [vmem:[#allocation2 + $0x3f0] sm:$0xff]  }
  0x59   :  { %2380 = vmatprep.subr.bf16.mxu0 %v2667_v35  ;;  %v2721_v35 = vld [vmem:[#allocation2 + $0x338] sm:$0xff]  }
  0x5a   :  { %2401 = vmatpush3.bf16.msra.mxu1 %v2666_v33  ;;  %v2720_v33 = vld [vmem:[#allocation2 + $0x378] sm:$0xff]  }
  0x5b   :  { %2402 = vmatprep.subr.bf16.mxu1 %v2669_v37  ;;  %v50_v37 = vld [vmem:[%s3011_s0 + $0x18] sm:$0xff] }
  0x5c   :  { %2381 = vmatpush3.bf16.msra.mxu0 %v2668_v36  ;;  %v2722_v36 = vld [vmem:[#allocation2 + $0x3f8] sm:$0xff]  }
  0x5d   :  { %2382 = vmatprep.subr.bf16.mxu0 %v2671_v39  ;;  %v2723_v39 = vld [vmem:[#allocation2 + $0x3b8] sm:$0xff]  }
  0x5e   :  { %2403 = vmatpush3.bf16.msra.mxu1 %v2670_v38  ;;  %v115_v38 = vrot.slane %v50_v37, %v2861_v34 }
  0x5f   :  { %2404 = vmatprep.subr.bf16.mxu1 %v2673_v41  ;;  %v2724_v41 = vld [vmem:[#allocation2 + $0x440] sm:$0xff]  }
  0x60   :  { %2383 = vmatpush3.bf16.msra.mxu0 %v2672_v40  ;;  %v108_v40 = vcombine.high %v50_v37, %v50_v37  ;;  %v2757_v37 = vld [vmem:[%s3016_s5 + $0x20] sm:$0xff]  }
  0x61   :  { %2384 = vmatprep.subr.bf16.mxu0 %v2675_v43 }
  0x62   :  { %2405 = vmatpush3.bf16.msra.mxu1 %v2674_v42  ;;  %v123_v42 = vcombine.high %v115_v38, %v115_v38  ;;  %v122_v43 = vrot.slane %v108_v40, %v2861_v34 }
  0x63   :  { %2406 = vmatprep.subr.bf16.mxu1 %v2677_v45 }
  0x64   :  { %2385 = vmatpush3.bf16.msra.mxu0 %v2676_v44  ;;  %v172_v44 = vpack.c.bf16 %v115_v38, %v115_v38  ;;  %v173_v45 = vpack.c.bf16 %v123_v42, %v123_v42  ;;  %v2758_v38 = vld [vmem:[%s3016_s5 + $0x28] sm:$0xff]  }
  0x65   :  { %2386 = vmatprep.subr.bf16.mxu0 %v2679_v47  ;;  %v2726_v47 = vld [vmem:[#allocation2 + $0x400] sm:$0xff]  }
  0x66   :  { %2407 = vmatpush3.bf16.msra.mxu1 %v2678_v46  ;;  %v124_v46 = vcombine.high %v122_v43, %v122_v43 }
  0x67   :  { %2408 = vmatprep.subr.bf16.mxu1 %v2681_v49  ;;  %v2727_v49 = vld [vmem:[#allocation2 + $0x448] sm:$0xff]  }
  0x68   :  { %2387 = vmatpush3.bf16.msra.mxu0 %v2680_v48  ;;  %v174_v48 = vpack.c.bf16 %v122_v43, %v122_v43 }
  0x69   :  { %2388 = vmatprep.subr.bf16.mxu0 %v2683_v51  ;;  %v2797_v51 = vmov 0.0  }
  0x6a   :  { %2409 = vmatpush3.bf16.msra.mxu1 %v2682_v50  ;;  %v175_v50 = vpack.c.bf16 %v124_v46, %v124_v46 }
  0x6b   :  { %2410 = vmatprep.subr.bf16.mxu1 %v2685_v53  ;;  %v2729_v53 = vld [vmem:[#allocation2 + $0x450] sm:$0xff]  }
  0x6c   :  { %2389 = vmatpush3.bf16.msra.mxu0 %v2684_v52  ;;  %v2728_v52 = vld [vmem:[#allocation2 + $0x408] sm:$0xff]  }
  0x6d   :  { %2390 = vmatprep.subr.bf16.mxu0 %v2687_v55  ;;  %v2731_v55 = vld [vmem:[#allocation2 + $0x458] sm:$0xff]  }
  0x6e   :  { %2411 = vmatpush3.bf16.msra.mxu1 %v2686_v54  ;;  %v2730_v54 = vld [vmem:[#allocation2 + $0x410] sm:$0xff]  }
  0x6f   :  { %2412 = vmatprep.subr.bf16.mxu1 %v2689_v57  ;;  %v2732_v57 = vld [vmem:[#allocation2 + $0x418] sm:$0xff]  }
  0x70   :  { %2391 = vmatpush3.bf16.msra.mxu0 %v2688_v56  ;;  %v2737_v56 = vld [vmem:[#allocation2 + $0x480] sm:$0xff]  }
  0x71   :  { %2420 = vmatprep.subr.bf16.mxu0 %v2691_v62  ;;  %v2735_v62 = vld [vmem:[#allocation2 + $0x468] sm:$0xff]  }
  0x72   :  { %2413 = vmatpush3.bf16.msra.mxu1 %v2690_v60  ;;  %v2734_v60 = vld [vmem:[#allocation2 + $0x420] sm:$0xff]  }
  0x73   :  { %1559 = vmatmul.mubr.bf16.vlgmr.msra.gmra.mrb[8].mxu0 %v168_v2  ;;  %2442 = vmatprep.subr.bf16.mxu1 %v2694_v3  ;;  %v139_v2 = vrot.slane %v125_v63, %v2861_v34  ;;  %v140_v3 = vcombine.high %v132_v0, %v132_v0  ;;  %v2742_v34 = vld [vmem:[#allocation2 + $0x438] sm:$0xff]  }
  0x74   :  { %2421 = vmatpush3.bf16.msra.mxu0 %v2693_v1  ;;  %1638 = vmatprep.mubr.bf16.mxu0 %v173_v45  ;;  %v2744_v1 = vld [vmem:[#allocation2 + $0x490] sm:$0xff]  }
  0x75   :  { %1599 = vmatmul.mubr.bf16.vlgmr.msra.gmra.mrb[8].mxu1 %v170_v7  ;;  %2422 = vmatprep.subr.bf16.mxu0 %v2696_v8  ;;  %v178_v7 = vpack.c.bf16 %v139_v2, %v139_v2  ;;  %v2739_v8 = vld [vmem:[#allocation2 + $0x430] sm:$0xff]  }
  0x76   :  { %2443 = vmatpush3.bf16.msra.mxu1 %v2695_v6  ;;  %1678 = vmatprep.mubr.bf16.mxu1 %v175_v50  ;;  %v177_v6 = vpack.c.bf16 %v140_v3, %v140_v3 }
  0x77   :  { %2444 = vmatprep.subr.bf16.mxu1 %v2698_v11  ;;  %v2745_v11 = vld [vmem:[%s3014_s3] sm:$0xff]  }
  0x78   :  { %2423 = vmatpush3.bf16.msra.mxu0 %v2697_v10  ;;  %v176_v10 = vpack.c.bf16 %v132_v0, %v132_v0 }
  0x79   :  { %2424 = vmatprep.subr.bf16.mxu0 %v2700_v13  ;;  %v2747_v13 = vld [vmem:[%s3014_s3 + $0x10] sm:$0xff]  }
  0x7a   :  { %2445 = vmatpush3.bf16.msra.mxu1 %v2699_v12  ;;  %v2746_v12 = vld [vmem:[%s3014_s3 + $0x8] sm:$0xff]  }
  0x7b   :  { %2446 = vmatprep.subr.bf16.mxu1 %v2702_v15  ;;  %v2749_v15 = vld [vmem:[%s3014_s3 + $0x20] sm:$0xff]  }
  0x7c   :  { %2425 = vmatpush3.bf16.msra.mxu0 %v2701_v14  ;;  %v2748_v14 = vld [vmem:[%s3014_s3 + $0x18] sm:$0xff]  }
  0x7d   :  { %2426 = vmatprep.subr.bf16.mxu0 %v2704_v17  ;;  %v2750_v17 = vld [vmem:[%s3014_s3 + $0x28] sm:$0xff]  }
  0x7e   :  { %2447 = vmatpush3.bf16.msra.mxu1 %v2703_v16 }
  0x7f   :  { %2448 = vmatprep.subr.bf16.mxu1 %v2706_v19 }
  0x80   :  { %2427 = vmatpush3.bf16.msra.mxu0 %v2705_v18  ;;  %v2112_v18 = vld [vmem:[%s3013_s2] ss:$0 sm:$0xff] }
  0x81   :  { %2428 = vmatprep.subr.bf16.mxu0 %v2708_v21 }
  0x82   :  { %2449 = vmatpush3.bf16.msra.mxu1 %v2707_v20 }
  0x83   :  { %2450 = vmatprep.subr.bf16.mxu1 %v2710_v23 }
  0x84   :  { %2429 = vmatpush3.bf16.msra.mxu0 %v2709_v22 }
  0x85   :  { %2430 = vmatprep.subr.bf16.mxu0 %v2712_v25 }
  0x86   :  { %2451 = vmatpush3.bf16.msra.mxu1 %v2711_v24 }
  0x87   :  { %2452 = vmatprep.subr.bf16.mxu1 %v2714_v27 }
  0x88   :  { %2431 = vmatpush3.bf16.msra.mxu0 %v2713_v26 }
  0x89   :  { %2432 = vmatprep.subr.bf16.mxu0 %v2716_v29 }
  0x8a   :  { %2453 = vmatpush3.bf16.msra.mxu1 %v2715_v28  ;;  %v2751_v28 = vld [vmem:[%s3014_s3 + $0x30] sm:$0xff]  }
  0x8b   :  { %2454 = vmatprep.subr.bf16.mxu1 %v2718_v31  ;;  %v2752_v31 = vld [vmem:[%s3014_s3 + $0x38] sm:$0xff]  }
  0x8c   :  { %2433 = vmatpush3.bf16.msra.mxu0 %v2717_v30 }
  0x8d   :  { %2434 = vmatprep.subr.bf16.mxu0 %v2720_v33  ;;  %v2754_v33 = vld [vmem:[%s3016_s5 + $0x8] sm:$0xff]  }
  0x8e   :  { %2455 = vmatpush3.bf16.msra.mxu1 %v2719_v32  ;;  %v2753_v32 = vld [vmem:[%s3016_s5] sm:$0xff]  }
  0x8f   :  { %2456 = vmatprep.subr.bf16.mxu1 %v2722_v36  ;;  %v2756_v36 = vld [vmem:[%s3016_s5 + $0x18] sm:$0xff]  }
  0x90   :  { %2435 = vmatpush3.bf16.msra.mxu0 %v2721_v35  ;;  %v2755_v35 = vld [vmem:[%s3016_s5 + $0x10] sm:$0xff]  }
  0x91   :  { %2464 = vmatprep.subr.bf16.mxu0 %v2724_v41 }
  0x92   :  { %2457 = vmatpush3.bf16.msra.mxu1 %v2723_v39 }
  0x93   :  { %2517 = vmatprep.subr.bf16.mxu1 %v2797_v51  ;;  %1639 = vmatmul.mubr.bf16.vlgmr.msra.gmra.mrb[12].mxu0 %v172_v44 }
  0x94   :  { %2465 = vmatpush3.bf16.msra.mxu0 %v2726_v47  ;;  %1718 = vmatprep.mubr.bf16.mxu0 %v177_v6 }
  0x95   :  { %1679 = vmatmul.mubr.bf16.vlgmr.msra.gmra.mrb[12].mxu1 %v174_v48  ;;  %2466 = vmatprep.subr.bf16.mxu0 %v2727_v49 }
  0x96   :  { %2523 = vmatprep.mubr.msk.bf16.mxu1 %vm2798_vm0, %v2797_v51  ;;  %2518 = vmatpush3.bf16.msra.mxu1 %v2737_v56 }
  0x97   :  { %2519 = vmatprep.subr.bf16.mxu1 %v2797_v51 }
  0x98   :  { %2467 = vmatpush3.bf16.msra.mxu0 %v2728_v52 }
  0x99   :  { %2468 = vmatprep.subr.bf16.mxu0 %v2729_v53 }
  0x9a   :  { %2520 = vmatpush3.bf16.msra.mxu1 %v2740_v58 }
  0x9b   :  { %2521 = vmatprep.subr.bf16.mxu1 %v2797_v51 }
  0x9c   :  { %2469 = vmatpush3.bf16.msra.mxu0 %v2730_v54 }
  0x9d   :  { %2470 = vmatprep.subr.bf16.mxu0 %v2731_v55 }
  0x9e   :  { %2522 = vmatpush3.bf16.msra.mxu1 %v2744_v1 }
  0x9f   :  { %2527 = vmatprep.subr.bf16.mxu1 %v2797_v51 }
  0xa0   :  { %2471 = vmatpush3.bf16.msra.mxu0 %v2732_v57 }
  0xa1   :  { %2472 = vmatprep.subr.bf16.mxu0 %v2733_v59  ;;  %2524 = vmatmul.mubr.msk.bf16.vlgmr.msra.gmra.mrb[16].mxu1 %vm1362_vm1, %v178_v7 }
  0xa2   :  { %2543 = vmatprep.mubr.msk.bf16.mxu1 %vm2798_vm0, %v2797_v51  ;;  %2528 = vmatpush3.bf16.msra.mxu1 %v2745_v11 }
  0xa3   :  { %2529 = vmatprep.subr.bf16.mxu1 %v2797_v51 }
  0xa4   :  { %2473 = vmatpush3.bf16.msra.mxu0 %v2734_v60 }
  0xa5   :  { %2474 = vmatprep.subr.bf16.mxu0 %v2735_v62 }
  0xa6   :  { %2530 = vmatpush3.bf16.msra.mxu1 %v2746_v12 }
  0xa7   :  { %2531 = vmatprep.subr.bf16.mxu1 %v2797_v51 }
  0xa8   :  { %2475 = vmatpush3.bf16.msra.mxu0 %v2736_v4 }
  0xa9   :  { %2476 = vmatprep.subr.bf16.mxu0 %v2738_v5 }
  0xaa   :  { %2532 = vmatpush3.bf16.msra.mxu1 %v2747_v13 }
  0xab   :  { %2533 = vmatprep.subr.bf16.mxu1 %v2797_v51 }
  0xac   :  { %2477 = vmatpush3.bf16.msra.mxu0 %v2739_v8 }
  0xad   :  { %2478 = vmatprep.subr.bf16.mxu0 %v2741_v9 }
  0xae   :  { %2534 = vmatpush3.bf16.msra.mxu1 %v2748_v14 }
  0xaf   :  { %2535 = vmatprep.subr.bf16.mxu1 %v2797_v51 }
  0xb0   :  { %2479 = vmatpush3.bf16.msra.mxu0 %v2742_v34 }
  0xb1   :  { %2547 = vmatprep.subr.bf16.mxu0 %v2797_v51 }
  0xb2   :  { %2536 = vmatpush3.bf16.msra.mxu1 %v2749_v15 }
  0xb3   :  { %1719 = vmatmul.mubr.bf16.vlgmr.msra.gmra.mrb[16].mxu0 %v176_v10  ;;  %2537 = vmatprep.subr.bf16.mxu1 %v2797_v51 }
  0xb4   :  { %2563 = vmatprep.mubr.msk.bf16.mxu0 %vm2798_vm0, %v2797_v51  ;;  %2548 = vmatpush3.bf16.msra.mxu0 %v2753_v32  ;;  %v2261_v32 = vld [vmem:[%s3015_s4] ss:$0 sm:$0xff] }
  0xb5   :  { %2549 = vmatprep.subr.bf16.mxu0 %v2797_v51 }
  0xb6   :  { %2538 = vmatpush3.bf16.msra.mxu1 %v2750_v17 }
  0xb7   :  { %2539 = vmatprep.subr.bf16.mxu1 %v2797_v51 }
  0xb8   :  { %2550 = vmatpush3.bf16.msra.mxu0 %v2754_v33 }
  0xb9   :  { %2551 = vmatprep.subr.bf16.mxu0 %v2797_v51 }
  0xba   :  { %2540 = vmatpush3.bf16.msra.mxu1 %v2751_v28  ;;  %v2763_v28 = vld [vmem:[%s3018_s7 + $0x10] sm:$0xff]  }
  0xbb   :  { %2541 = vmatprep.subr.bf16.mxu1 %v2797_v51 }
  0xbc   :  { %2552 = vmatpush3.bf16.msra.mxu0 %v2755_v35 }
  0xbd   :  { %2553 = vmatprep.subr.bf16.mxu0 %v2797_v51 }
  0xbe   :  { %2542 = vmatpush3.bf16.msra.mxu1 %v2752_v31  ;;  %v2766_v31 = vld [vmem:[%s3018_s7 + $0x28] sm:$0xff]  }
  0xbf   :  { %2567 = vmatprep.subr.bf16.mxu1 %v2797_v51 }
  0xc0   :  { %2554 = vmatpush3.bf16.msra.mxu0 %v2756_v36 }
  0xc1   :  { %2555 = vmatprep.subr.bf16.mxu0 %v2797_v51 }
  0xc4   :  { %2556 = vmatpush3.bf16.msra.mxu0 %v2757_v37 }
  0xc5   :  { %2557 = vmatprep.subr.bf16.mxu0 %v2797_v51 }
  0xc8   :  { %2558 = vmatpush3.bf16.msra.mxu0 %v2758_v38 }
  0xc9   :  { %2559 = vmatprep.subr.bf16.mxu0 %v2797_v51 }
 0x106   :  { %v2304_v16 = vpop.f32.mrb[0].mxu0 }
 0x107   :  { %v2305_v19 = vpop.f32.mrb[1].mxu0 }
 0x108   :  { %v2306_v20 = vadd.f32 %v2305_v19, %v2304_v16  ;;  %v2307_v21 = vpop.f32.mrb[2].mxu0  ;;  %v2326_v22 = vpop.f32.mrb[0].mxu1 }
 0x109   :  { %v2308_v23 = vpop.f32.mrb[3].mxu0  ;;  %v2327_v24 = vpop.f32.mrb[1].mxu1 }
 0x10a   :  { %v1401_v25 = vadd.f32 %v2306_v20, %v2112_v18  ;;  %v2328_v26 = vadd.f32 %v2327_v24, %v2326_v22  ;;  %v2329_v27 = vpop.f32.mrb[2].mxu1  ;;  %v2759_v24 = vld [vmem:[%s3016_s5 + $0x30] sm:$0xff]  }
 0x10b   :  { %v2330_v29 = vpop.f32.mrb[3].mxu1  ;;  %2560 = vmatpush3.bf16.msra.mxu0 %v2759_v24  ;;  %v2762_v27 = vld [vmem:[%s3018_s7 + $0x8] sm:$0xff]  }
 0x10c   :  { %v1441_v30 = vadd.f32 %v2328_v26, %v1401_v25  ;;  %2561 = vmatprep.subr.bf16.mxu0 %v2797_v51  ;;  %v2760_v25 = vld [vmem:[%s3016_s5 + $0x38] sm:$0xff]   ;;  %v2761_v26 = vld [vmem:[%s3018_s7] sm:$0xff]  }
 0x10d   :  { %v2764_v29 = vld [vmem:[%s3018_s7 + $0x18] sm:$0xff]  }
 0x10f   :  { %2562 = vmatpush3.bf16.msra.mxu0 %v2760_v25 }
 0x126   :  { %v2348_v39 = vpop.f32.mrb[4].mxu0 }
 0x127   :  { %v2349_v40 = vpop.f32.mrb[5].mxu0 }
 0x128   :  { %v2350_v41 = vadd.f32 %v2349_v40, %v2348_v39  ;;  %v2351_v42 = vpop.f32.mrb[6].mxu0  ;;  %v2370_v43 = vpop.f32.mrb[4].mxu1 }
 0x129   :  { %v2352_v44 = vpop.f32.mrb[7].mxu0  ;;  %v2371_v45 = vpop.f32.mrb[5].mxu1  ;;  %v2768_v42 = vld [vmem:[%s3018_s7 + $0x38] sm:$0xff]  }
 0x12a   :  { %v1481_v46 = vadd.f32 %v2350_v41, %v1441_v30  ;;  %v2372_v47 = vadd.f32 %v2371_v45, %v2370_v43  ;;  %v2373_v48 = vpop.f32.mrb[6].mxu1  ;;  %v2765_v30 = vld [vmem:[%s3018_s7 + $0x20] sm:$0xff]   ;;  %v2767_v41 = vld [vmem:[%s3018_s7 + $0x30] sm:$0xff]  }
 0x12b   :  { %v2374_v49 = vpop.f32.mrb[7].mxu1  ;;  %v2270_v43 = vld [vmem:[%s3017_s6] ss:$0 sm:$0xff] }
 0x12c   :  { %v1521_v50 = vadd.f32 %v2372_v47, %v1481_v46 }
 0x146   :  { %v2392_v52 = vpop.f32.mrb[8].mxu0 }
 0x147   :  { %v2393_v53 = vpop.f32.mrb[9].mxu0 }
 0x148   :  { %v2394_v54 = vadd.f32 %v2393_v53, %v2392_v52  ;;  %v2395_v55 = vpop.f32.mrb[10].mxu0  ;;  %v2414_v56 = vpop.f32.mrb[8].mxu1 }
 0x149   :  { %v2396_v57 = vpop.f32.mrb[11].mxu0  ;;  %v2415_v58 = vpop.f32.mrb[9].mxu1 }
 0x14a   :  { %v1561_v59 = vadd.f32 %v2394_v54, %v1521_v50  ;;  %v2416_v60 = vadd.f32 %v2415_v58, %v2414_v56  ;;  %v2417_v61 = vpop.f32.mrb[10].mxu1 }
 0x14b   :  { %v2418_v62 = vpop.f32.mrb[11].mxu1 }
 0x14c   :  { %v1601_v63 = vadd.f32 %v2416_v60, %v1561_v59 }
 0x166   :  { %v2436_v0 = vpop.f32.mrb[12].mxu0 }
 0x167   :  { %v2437_v1 = vpop.f32.mrb[13].mxu0 }
 0x168   :  { %v2438_v2 = vadd.f32 %v2437_v1, %v2436_v0  ;;  %v2439_v3 = vpop.f32.mrb[14].mxu0  ;;  %v2458_v4 = vpop.f32.mrb[12].mxu1 }
 0x169   :  { %v2440_v5 = vpop.f32.mrb[15].mxu0  ;;  %v2459_v6 = vpop.f32.mrb[13].mxu1 }
 0x16a   :  { %v1641_v7 = vadd.f32 %v2438_v2, %v1601_v63  ;;  %v2460_v8 = vadd.f32 %v2459_v6, %v2458_v4  ;;  %v2461_v9 = vpop.f32.mrb[14].mxu1 }
 0x16b   :  { %v2462_v34 = vpop.f32.mrb[15].mxu1 }
 0x16c   :  { %v1681_v10 = vadd.f32 %v2460_v8, %v1641_v7 }
 0x174   :  { %v1760_v11 = vpop.f32.mrb[16].mxu1 }
 0x175   :  { %v2525_v12 = vpop.f32.mrb[17].mxu1 }
 0x176   :  { %v1763_v13 = vpop.f32.mrb[18].mxu1 }
 0x177   :  { %v2526_v14 = vpop.f32.mrb[19].mxu1 }
 0x186   :  { %v2480_v15 = vpop.f32.mrb[16].mxu0 }
 0x187   :  { %v2481_v16 = vpop.f32.mrb[17].mxu0 }
 0x188   :  { %v2482_v17 = vadd.f32 %v2481_v16, %v2480_v15  ;;  %v2483_v18 = vpop.f32.mrb[18].mxu0 }
 0x189   :  { %v2484_v19 = vpop.f32.mrb[19].mxu0 }
 0x18a   :  { %v1721_v20 = vadd.f32 %v2482_v17, %v1681_v10 }
 0x18c   :  { %v1761_v21 = vadd.f32 %v1760_v11, %v1721_v20 }
 0x18e   :  { %v1766_v22 = vmax.f32 %v1761_v21, 0.0 }
 0x190   :  { %v1767_v23 = vpack.c.bf16 %v1766_v22, %v1766_v22 }
 0x192   :  { %2544 = vmatmul.mubr.bf16.vlgmr.msra.gmra.mrb[20].mxu1 %v1767_v23 }
 0x193   :  { %2583 = vmatprep.mubr.msk.bf16.mxu1 %vm2798_vm0, %v2797_v51  ;;  %2568 = vmatpush3.bf16.msra.mxu1 %v2761_v26 }
 0x194   :  { %2569 = vmatprep.subr.bf16.mxu1 %v2797_v51 }
 0x197   :  { %2570 = vmatpush3.bf16.msra.mxu1 %v2762_v27 }
 0x198   :  { %2571 = vmatprep.subr.bf16.mxu1 %v2797_v51 }
 0x19b   :  { %2572 = vmatpush3.bf16.msra.mxu1 %v2763_v28 }
 0x19c   :  { %2573 = vmatprep.subr.bf16.mxu1 %v2797_v51 }
 0x19f   :  { %2574 = vmatpush3.bf16.msra.mxu1 %v2764_v29 }
 0x1a0   :  { %2575 = vmatprep.subr.bf16.mxu1 %v2797_v51 }
 0x1a3   :  { %2576 = vmatpush3.bf16.msra.mxu1 %v2765_v30 }
 0x1a4   :  { %2577 = vmatprep.subr.bf16.mxu1 %v2797_v51 }
 0x1a7   :  { %2578 = vmatpush3.bf16.msra.mxu1 %v2766_v31 }
 0x1a8   :  { %2579 = vmatprep.subr.bf16.mxu1 %v2797_v51 }
 0x1ab   :  { %2580 = vmatpush3.bf16.msra.mxu1 %v2767_v41 }
 0x1ac   :  { %2581 = vmatprep.subr.bf16.mxu1 %v2797_v51  ;;  %v2279_v51 = vld [vmem:[%s3019_s8] ss:$0 sm:$0xff] }
 0x1af   :  { %2582 = vmatpush3.bf16.msra.mxu1 %v2768_v42 }
 0x265   :  { %v1873_v33 = vpop.f32.mrb[20].mxu1 }
 0x266   :  { %v1874_v35 = vadd.f32 %v2261_v32, %v1873_v33  ;;  %v2545_v36 = vpop.f32.mrb[21].mxu1 }
 0x267   :  { %v1876_v37 = vpop.f32.mrb[22].mxu1 }
 0x268   :  { %v1879_v38 = vmax.f32 %v1874_v35, 0.0  ;;  %v2546_v39 = vpop.f32.mrb[23].mxu1 }
 0x26a   :  { %v1880_v40 = vpack.c.bf16 %v1879_v38, %v1879_v38 }
 0x26c   :  { %2564 = vmatmul.mubr.bf16.vlgmr.msra.gmra.mrb[20].mxu0 %v1880_v40 }
 0x33f   :  { %v1986_v44 = vpop.f32.mrb[20].mxu0 }
 0x340   :  { %v1987_v45 = vadd.f32 %v2270_v43, %v1986_v44  ;;  %v2565_v46 = vpop.f32.mrb[21].mxu0 }
 0x341   :  { %v1989_v47 = vpop.f32.mrb[22].mxu0 }
 0x342   :  { %v1992_v48 = vmax.f32 %v1987_v45, 0.0  ;;  %v2566_v49 = vpop.f32.mrb[23].mxu0 }
 0x344   :  { %v1993_v50 = vpack.c.bf16 %v1992_v48, %v1992_v48 }
 0x346   :  { %2584 = vmatmul.mubr.bf16.vlgmr.msra.gmra.mrb[24].mxu1 %v1993_v50 }
 0x419   :  { %v2099_v52 = vpop.f32.mrb[24].mxu1 }
 0x41a   :  { %v2100_v53 = vadd.f32 %v2279_v51, %v2099_v52  ;;  %v2585_v54 = vpop.f32.mrb[25].mxu1 }
 0x41b   :  { %v2102_v55 = vpop.f32.mrb[26].mxu1 }
 0x41c   :  { %v2105_v56 = vpack.c.bf16 %v2100_v53, %v2100_v53  ;;  %v2586_v57 = vpop.f32.mrb[27].mxu1 }
 0x41e   :  { %2106 = vst [vmem:[%s3020_s9] sm:$0x1] %v2105_v56 }
 0x41f   :  { %2111 = vsyncpa [#allocation3], 1 }

</bundles_post_ra>
